<compile_context>
chip_gen: v7x
topology: tpu7x:2x2x1
jax: 0.10.0
libtpu: 0.0.40
codegen_flags: <defaults>
</compile_context>

<pallas_src>
import jax
import jax.numpy as jnp
from jax.experimental import pallas as pl
from jax.experimental.pallas import tpu as pltpu

ATOM_TYPES = [1, 6, 7, 8, 9, 15, 16, 17, 35, 53]
LATENT_DIM = 64
F0 = len(ATOM_TYPES)            # 10
H1, H2, H3 = 128, 256, 256
SMALL_N_MAX = 512               # below this the whole problem fits VMEM -> fused kernel

_VMEM_SPEC = pl.BlockSpec(memory_space=pltpu.MemorySpace.VMEM)


def _round_up(n, m):
    return ((n + m - 1) // m) * m


def _vmem_capacity_bytes():
    try:
        return int(pltpu.get_tpu_info().vmem_capacity_bytes)
    except Exception:
        return 64 * 2**20       # conservative (v7x per-TC)


# --------------------------------- kernels ---------------------------------

def _fused_encoder_kernel(a_ref, xw1_ref, pool_ref,
                          w2_ref, w3_ref, wh_ref,
                          b1_ref, b2_ref, b3_ref, bh_ref, o_ref):
    """Everything-resident path: 3 GCN layers + mean pool + fused mu/logvar head."""
    bf16 = jnp.bfloat16
    a = a_ref[...]
    h = jnp.maximum(jnp.dot(a, xw1_ref[...], preferred_element_type=jnp.float32)
                    + b1_ref[...], 0.0).astype(bf16)                           # (N, 128)
    ah = jnp.dot(a, h, preferred_element_type=jnp.float32).astype(bf16)
    h = jnp.maximum(jnp.dot(ah, w2_ref[...], preferred_element_type=jnp.float32)
                    + b2_ref[...], 0.0).astype(bf16)                           # (N, 256)
    ah = jnp.dot(a, h, preferred_element_type=jnp.float32).astype(bf16)
    h = jnp.maximum(jnp.dot(ah, w3_ref[...], preferred_element_type=jnp.float32)
                    + b3_ref[...], 0.0).astype(bf16)                           # (N, 256)
    pooled = jnp.dot(pool_ref[...], h, preferred_element_type=jnp.float32).astype(bf16)
    o_ref[...] = (jnp.dot(pooled, wh_ref[...], preferred_element_type=jnp.float32)
                  + bh_ref[...])                                               # (B, 128)


def _gcn_first_kernel(a_ref, xw1_ref, b_ref, o_ref):
    # relu(A_tile @ (X W1) + b1); X @ W1 pre-gathered in the glue (X one-hot).
    acc = jnp.dot(a_ref[...], xw1_ref[...], preferred_element_type=jnp.float32)
    o_ref[...] = jnp.maximum(acc + b_ref[...], 0.0).astype(o_ref.dtype)


def _gcn_layer_kernel(a_ref, h_ref, w_ref, b_ref, o_ref):
    # relu((A_tile @ h) @ W + b) -- associativity-equivalent to A @ (h W) + b.
    ah = jnp.dot(a_ref[...], h_ref[...], preferred_element_type=jnp.float32)
    acc = jnp.dot(ah.astype(jnp.bfloat16), w_ref[...],
                  preferred_element_type=jnp.float32)
    o_ref[...] = jnp.maximum(acc + b_ref[...], 0.0).astype(o_ref.dtype)


def _gcn_pool_kernel(a_ref, pool_ref, h_ref, w_ref, b_ref, part_ref):
    # Layer 3 fused with global mean pool: h3 never round-trips HBM.
    ah = jnp.dot(a_ref[...], h_ref[...], preferred_element_type=jnp.float32)
    h3 = jnp.maximum(
        jnp.dot(ah.astype(jnp.bfloat16), w_ref[...],
                preferred_element_type=jnp.float32) + b_ref[...], 0.0
    ).astype(jnp.bfloat16)                                                     # (tm, 256)
    part = jnp.dot(pool_ref[...], h3, preferred_element_type=jnp.float32)      # (B, 256)
    part_ref[...] = part[None]


# ------------------------------ forward wrapper ------------------------------

def graph_encoder(a_hat, x, pool, params):
    """Forward pass. Returns (mu, logvar), each (num_graphs, LATENT_DIM)."""
    N = a_hat.shape[0]
    B = pool.shape[0]
    bf16 = jnp.bfloat16
    vmem_cap = _vmem_capacity_bytes()
    b_pad = _round_up(max(B, 8), 8)

    # X is one-hot over atom types -> X @ W1 is a pure row gather (no padded K=10 matmul).
    xw1 = jnp.take(params["w1"], jnp.argmax(x, axis=-1), axis=0).astype(bf16)

    b1, b2, b3 = params["b1"], params["b2"], params["b3"]
    w2 = params["w2"].astype(bf16)
    w3 = params["w3"].astype(bf16)
    # mu/logvar heads fused -> one lane-dense (256, 128) weight / 128-wide store.
    w_head = jnp.concatenate([params["wmu"], params["wlv"]], axis=1).astype(bf16)
    b_head = jnp.concatenate([params["bmu"], params["blv"]], axis=1).astype(jnp.float32)

    if N <= SMALL_N_MAX:
        # ---------------- fully fused, everything VMEM-resident ----------------
        n_pad = _round_up(max(N, 8), 8)
        a_p = jnp.zeros((n_pad, n_pad), bf16).at[:N, :N].set(a_hat.astype(bf16))
        xw1_p = jnp.zeros((n_pad, H1), bf16).at[:N].set(xw1)
        pool_p = jnp.zeros((b_pad, n_pad), bf16).at[:B, :N].set(pool.astype(bf16))

        out = pl.pallas_call(
            _fused_encoder_kernel,
            out_shape=jax.ShapeDtypeStruct((b_pad, 2 * LATENT_DIM), jnp.float32),
            in_specs=[_VMEM_SPEC] * 10,
            out_specs=_VMEM_SPEC,
            compiler_params=pltpu.CompilerParams(
                vmem_limit_bytes=int(min(32 * 2**20, vmem_cap - 16 * 2**20))),
            cost_estimate=pl.CostEstimate(
                flops=(2 * n_pad * n_pad * (2 * H1 + H2)
                       + 2 * n_pad * (H1 * H2 + H2 * H3)
                       + 2 * b_pad * (n_pad * H3 + H3 * 2 * LATENT_DIM)),
                transcendentals=0,
                bytes_accessed=(n_pad * n_pad * 2 + n_pad * H1 * 2 + b_pad * n_pad * 2
                                + (H1 * H2 + H2 * H3 + H3 * 2 * LATENT_DIM) * 2
                                + b_pad * 2 * LATENT_DIM * 4)),
        )(a_p, xw1_p, pool_p, w2, w3, w_head, b1, b2, b3, b_head)
        return out[:B, :LATENT_DIM], out[:B, LATENT_DIM:]

    # -------------------------- row-tiled grid path --------------------------
    # Generation-gated row tile: 512 on 128 MiB chips (v5e/v6e), 256 on v7x (64 MiB).
    tile_m = 512 if vmem_cap >= 100 * 2**20 else 256
    n_pad = _round_up(N, tile_m)
    grid = (n_pad // tile_m,)

    a_p = jnp.zeros((n_pad, n_pad), bf16).at[:N, :N].set(a_hat.astype(bf16))
    xw1_p = jnp.zeros((n_pad, H1), bf16).at[:N].set(xw1)
    pool_p = jnp.zeros((b_pad, n_pad), bf16).at[:B, :N].set(pool.astype(bf16))
    a_bytes = n_pad * n_pad * 2

    def vmem_limit(need):
        # exact buffer accounting + 25% margin, capped below physical VMEM (headroom
        # left for Mosaic internal scratch).
        return int(min(max(int(need * 1.25), 16 * 2**20), vmem_cap - 16 * 2**20))

    a_spec = pl.BlockSpec((tile_m, n_pad), lambda i: (i, 0))

    # ---- layer 1: h1 = relu(A @ (X W1) + b1) ----
    need1 = (2 * tile_m * n_pad * 2            # A row tile (double-buffered)
             + n_pad * H1 * 2 + H1 * 4         # resident xw1, b1 (single copy)
             + 2 * tile_m * H1 * 2)            # output tile (double-buffered)
    h1 = pl.pallas_call(
        _gcn_first_kernel,
        out_shape=jax.ShapeDtypeStruct((n_pad, H1), bf16),
        grid=grid,
        in_specs=[a_spec, _VMEM_SPEC, _VMEM_SPEC],
        out_specs=pl.BlockSpec((tile_m, H1), lambda i: (i, 0)),
        compiler_params=pltpu.CompilerParams(
            dimension_semantics=("parallel",),
            vmem_limit_bytes=vmem_limit(need1)),
        cost_estimate=pl.CostEstimate(
            flops=2 * n_pad * n_pad * H1, transcendentals=0,
            bytes_accessed=a_bytes + 2 * n_pad * H1 * 2 + H1 * 4),
    )(a_p, xw1_p, b1)

    # ---- layer 2: h2 = relu((A @ h1) @ W2 + b2) ----
    need2 = (2 * tile_m * n_pad * 2
             + n_pad * H1 * 2 + H1 * H2 * 2 + H2 * 4
             + 2 * tile_m * H2 * 2)
    h2 = pl.pallas_call(
        _gcn_layer_kernel,
        out_shape=jax.ShapeDtypeStruct((n_pad, H2), bf16),
        grid=grid,
        in_specs=[a_spec, _VMEM_SPEC, _VMEM_SPEC, _VMEM_SPEC],
        out_specs=pl.BlockSpec((tile_m, H2), lambda i: (i, 0)),
        compiler_params=pltpu.CompilerParams(
            dimension_semantics=("parallel",),
            vmem_limit_bytes=vmem_limit(need2)),
        cost_estimate=pl.CostEstimate(
            flops=2 * n_pad * n_pad * H1 + 2 * n_pad * H1 * H2, transcendentals=0,
            bytes_accessed=a_bytes + n_pad * (H1 + H2) * 2 + H1 * H2 * 2 + H2 * 4),
    )(a_p, h1, w2, b2)

    # ---- layer 3 fused with mean pool: per-row-tile partial pooled sums ----
    need3 = (2 * tile_m * n_pad * 2
             + 2 * b_pad * tile_m * 2           # pool column tile (double-buffered)
             + n_pad * H2 * 2 + H2 * H3 * 2 + H3 * 4
             + 2 * b_pad * H3 * 4)              # partial output (double-buffered)
    partials = pl.pallas_call(
        _gcn_pool_kernel,
        out_shape=jax.ShapeDtypeStruct((grid[0], b_pad, H3), jnp.float32),
        grid=grid,
        in_specs=[a_spec,
                  pl.BlockSpec((b_pad, tile_m), lambda i: (0, i)),
                  _VMEM_SPEC, _VMEM_SPEC, _VMEM_SPEC],
        out_specs=pl.BlockSpec((1, b_pad, H3), lambda i: (i, 0, 0)),
        compiler_params=pltpu.CompilerParams(
            dimension_semantics=("parallel",),
            vmem_limit_bytes=vmem_limit(need3)),
        cost_estimate=pl.CostEstimate(
            flops=(2 * n_pad * n_pad * H2 + 2 * n_pad * H2 * H3
                   + 2 * b_pad * n_pad * H3),
            transcendentals=0,
            bytes_accessed=(a_bytes + b_pad * n_pad * 2 + n_pad * H2 * 2
                            + H2 * H3 * 2 + H3 * 4 + grid[0] * b_pad * H3 * 4)),
    )(a_p, pool_p, h2, w3, b3)

    pooled = partials.sum(axis=0)                                   # (b_pad, 256) f32
    # Tiny (B,256)x(256,128) head: plain JAX (not worth a kernel launch).
    out = (jnp.dot(pooled.astype(bf16), w_head, preferred_element_type=jnp.float32)
           + b_head)
    return out[:B, :LATENT_DIM], out[:B, LATENT_DIM:]


# ----------------------------- glue (plain JAX) -----------------------------

def build_norm_adj(edge_index, num_nodes):
    """D^{-1/2} (A + I) D^{-1/2}  (GCNConv default normalization)."""
    A = jnp.zeros((num_nodes, num_nodes), jnp.float32)
    A = A.at[edge_index[0], edge_index[1]].add(1.0)   # duplicates counted, like PyG
    A = A + jnp.eye(num_nodes, dtype=jnp.float32)
    deg = A.sum(axis=1)
    dinv = jnp.where(deg > 0, jax.lax.rsqrt(deg), 0.0)
    return dinv[:, None] * A * dinv[None, :]


def build_mean_pool(batch, num_graphs):
    """(B, N) matrix with row b = 1/|graph_b| on nodes of graph b."""
    onehot = jax.nn.one_hot(batch, num_graphs, dtype=jnp.float32).T
    counts = onehot.sum(axis=1, keepdims=True)
    return onehot / jnp.maximum(counts, 1.0)


def init_params(key):
    ks = jax.random.split(key, 10)

    def w(k, fan_in, fan_out):
        return jax.random.normal(k, (fan_in, fan_out), jnp.float32) / jnp.sqrt(fan_in)

    def b(k, dim):
        return 0.01 * jax.random.normal(k, (1, dim), jnp.float32)

    return {
        "w1": w(ks[0], F0, H1),      "b1": b(ks[1], H1),
        "w2": w(ks[2], H1, H2),      "b2": b(ks[3], H2),
        "w3": w(ks[4], H2, H3),      "b3": b(ks[5], H3),
        "wmu": w(ks[6], H3, LATENT_DIM),  "bmu": b(ks[7], LATENT_DIM),
        "wlv": w(ks[8], H3, LATENT_DIM),  "blv": b(ks[9], LATENT_DIM),
    }


def graph_encoder_ref(a_hat, x, pool, params):
    """Pure-JAX f32 reference (matches the PyTorch module semantics)."""
    h = jax.nn.relu(a_hat @ (x @ params["w1"]) + params["b1"])
    h = jax.nn.relu(a_hat @ (h @ params["w2"]) + params["b2"])
    h = jax.nn.relu(a_hat @ (h @ params["w3"]) + params["b3"])
    g = pool @ h
    return g @ params["wmu"] + params["bmu"], g @ params["wlv"] + params["blv"]


def chain_graph_batch(num_graphs, nodes_per_graph):
    """Batch of simple chain molecules; undirected edges, per-node graph ids."""
    srcs, dsts, batch = [], [], []
    for g in range(num_graphs):
        off = g * nodes_per_graph
        s = jnp.arange(off, off + nodes_per_graph - 1)
        srcs.append(s)
        dsts.append(s + 1)
        batch.append(jnp.full((nodes_per_graph,), g, jnp.int32))
    src = jnp.concatenate(srcs)
    dst = jnp.concatenate(dsts)
    edge_index = jnp.stack([jnp.concatenate([src, dst]),
                            jnp.concatenate([dst, src])]).astype(jnp.int32)
    return edge_index, jnp.concatenate(batch), num_graphs * nodes_per_graph


if __name__ == "__main__":
    key = jax.random.PRNGKey(0)
    k_feat, k_feat2, k_params = jax.random.split(key, 3)
    params = init_params(k_params)
    enc = jax.jit(graph_encoder)

    # ---- small batch (2 molecules, 16 nodes): fully fused VMEM-resident path ----
    edge_index, batch, N = chain_graph_batch(num_graphs=2, nodes_per_graph=8)
    atom_ids = jax.random.randint(k_feat, (N,), 0, F0)
    x = jax.nn.one_hot(atom_ids, F0, dtype=jnp.float32)
    a_hat = build_norm_adj(edge_index, N)
    pool = build_mean_pool(batch, 2)

    mu, logvar = enc(a_hat, x, pool, params)
    jax.block_until_ready((mu, logvar))
    mu_r, lv_r = graph_encoder_ref(a_hat, x, pool, params)
    assert mu.shape == (2, LATENT_DIM) and logvar.shape == (2, LATENT_DIM)
    assert bool(jnp.all(jnp.isfinite(mu))) and bool(jnp.all(jnp.isfinite(logvar)))
    assert float(jnp.max(jnp.abs(mu - mu_r))) < 5e-2
    assert float(jnp.max(jnp.abs(logvar - lv_r))) < 5e-2

    # ---- larger batch (3 x 200 nodes): row-tiled grid path, layer-3+pool fused ----
    edge_index, batch, N = chain_graph_batch(num_graphs=3, nodes_per_graph=200)
    atom_ids = jax.random.randint(k_feat2, (N,), 0, F0)
    x = jax.nn.one_hot(atom_ids, F0, dtype=jnp.float32)
    a_hat = build_norm_adj(edge_index, N)
    pool = build_mean_pool(batch, 3)

    mu, logvar = enc(a_hat, x, pool, params)
    jax.block_until_ready((mu, logvar))
    mu_r, lv_r = graph_encoder_ref(a_hat, x, pool, params)
    assert mu.shape == (3, LATENT_DIM) and logvar.shape == (3, LATENT_DIM)
    assert bool(jnp.all(jnp.isfinite(mu))) and bool(jnp.all(jnp.isfinite(logvar)))
    assert float(jnp.max(jnp.abs(mu - mu_r))) < 5e-2
    assert float(jnp.max(jnp.abs(logvar - lv_r))) < 5e-2

    print("KERNEL_OK")
</pallas_src>

<mosaic_0001>
module attributes {stable_mosaic.version = 11 : i64} {
  func.func @_fused_encoder_kernel(%arg0: memref<16x16xbf16, #tpu.memory_space<vmem>>, %arg1: memref<16x128xbf16, #tpu.memory_space<vmem>>, %arg2: memref<8x16xbf16, #tpu.memory_space<vmem>>, %arg3: memref<128x256xbf16, #tpu.memory_space<vmem>>, %arg4: memref<256x256xbf16, #tpu.memory_space<vmem>>, %arg5: memref<256x128xbf16, #tpu.memory_space<vmem>>, %arg6: memref<1x128xf32, #tpu.memory_space<vmem>>, %arg7: memref<1x256xf32, #tpu.memory_space<vmem>>, %arg8: memref<1x256xf32, #tpu.memory_space<vmem>>, %arg9: memref<1x128xf32, #tpu.memory_space<vmem>>, %arg10: memref<8x128xf32, #tpu.memory_space<vmem>>) attributes {dimension_semantics = [], scalar_prefetch = 0 : i64, scratch_operands = 0 : i64, tpu.core_type = #tpu.core_type<tc>} {
    %c0 = arith.constant 0 : index
    %c0_0 = arith.constant 0 : index
    %0 = vector.load %arg0[%c0, %c0_0] : memref<16x16xbf16, #tpu.memory_space<vmem>>, vector<16x16xbf16>
    %c0_1 = arith.constant 0 : index
    %c0_2 = arith.constant 0 : index
    %1 = vector.load %arg1[%c0_1, %c0_2] : memref<16x128xbf16, #tpu.memory_space<vmem>>, vector<16x128xbf16>
    %cst = arith.constant dense<0.000000e+00> : vector<16x128xf32>
    %2 = tpu.matmul %0, %1, %cst {dimension_numbers = #tpu.dot_dimension_numbers<[1], [0], [0], [1], [0, 0, 1, 1], [], []>} : vector<16x16xbf16>, vector<16x128xbf16>, vector<16x128xf32> -> vector<16x128xf32>
    %c0_3 = arith.constant 0 : index
    %c0_4 = arith.constant 0 : index
    %3 = vector.load %arg6[%c0_3, %c0_4] : memref<1x128xf32, #tpu.memory_space<vmem>>, vector<1x128xf32>
    %4 = vector.broadcast %3 : vector<1x128xf32> to vector<16x128xf32>
    %5 = arith.addf %2, %4 : vector<16x128xf32>
    %cst_5 = arith.constant 0.000000e+00 : f32
    %6 = vector.broadcast %cst_5 : f32 to vector<16x128xf32>
    %7 = arith.maximumf %5, %6 : vector<16x128xf32>
    %8 = arith.truncf %7 : vector<16x128xf32> to vector<16x128xbf16>
    %cst_6 = arith.constant dense<0.000000e+00> : vector<16x128xf32>
    %9 = tpu.matmul %0, %8, %cst_6 {dimension_numbers = #tpu.dot_dimension_numbers<[1], [0], [0], [1], [0, 0, 1, 1], [], []>} : vector<16x16xbf16>, vector<16x128xbf16>, vector<16x128xf32> -> vector<16x128xf32>
    %10 = arith.truncf %9 : vector<16x128xf32> to vector<16x128xbf16>
    %c0_7 = arith.constant 0 : index
    %c0_8 = arith.constant 0 : index
    %11 = vector.load %arg3[%c0_7, %c0_8] : memref<128x256xbf16, #tpu.memory_space<vmem>>, vector<128x256xbf16>
    %cst_9 = arith.constant dense<0.000000e+00> : vector<16x256xf32>
    %12 = tpu.matmul %10, %11, %cst_9 {dimension_numbers = #tpu.dot_dimension_numbers<[1], [0], [0], [1], [0, 0, 1, 1], [], []>} : vector<16x128xbf16>, vector<128x256xbf16>, vector<16x256xf32> -> vector<16x256xf32>
    %c0_10 = arith.constant 0 : index
    %c0_11 = arith.constant 0 : index
    %13 = vector.load %arg7[%c0_10, %c0_11] : memref<1x256xf32, #tpu.memory_space<vmem>>, vector<1x256xf32>
    %14 = vector.broadcast %13 : vector<1x256xf32> to vector<16x256xf32>
    %15 = arith.addf %12, %14 : vector<16x256xf32>
    %cst_12 = arith.constant 0.000000e+00 : f32
    %16 = vector.broadcast %cst_12 : f32 to vector<16x256xf32>
    %17 = arith.maximumf %15, %16 : vector<16x256xf32>
    %18 = arith.truncf %17 : vector<16x256xf32> to vector<16x256xbf16>
    %cst_13 = arith.constant dense<0.000000e+00> : vector<16x256xf32>
    %19 = tpu.matmul %0, %18, %cst_13 {dimension_numbers = #tpu.dot_dimension_numbers<[1], [0], [0], [1], [0, 0, 1, 1], [], []>} : vector<16x16xbf16>, vector<16x256xbf16>, vector<16x256xf32> -> vector<16x256xf32>
    %20 = arith.truncf %19 : vector<16x256xf32> to vector<16x256xbf16>
    %c0_14 = arith.constant 0 : index
    %c0_15 = arith.constant 0 : index
    %21 = vector.load %arg4[%c0_14, %c0_15] : memref<256x256xbf16, #tpu.memory_space<vmem>>, vector<256x256xbf16>
    %cst_16 = arith.constant dense<0.000000e+00> : vector<16x256xf32>
    %22 = tpu.matmul %20, %21, %cst_16 {dimension_numbers = #tpu.dot_dimension_numbers<[1], [0], [0], [1], [0, 0, 1, 1], [], []>} : vector<16x256xbf16>, vector<256x256xbf16>, vector<16x256xf32> -> vector<16x256xf32>
    %c0_17 = arith.constant 0 : index
    %c0_18 = arith.constant 0 : index
    %23 = vector.load %arg8[%c0_17, %c0_18] : memref<1x256xf32, #tpu.memory_space<vmem>>, vector<1x256xf32>
    %24 = vector.broadcast %23 : vector<1x256xf32> to vector<16x256xf32>
    %25 = arith.addf %22, %24 : vector<16x256xf32>
    %cst_19 = arith.constant 0.000000e+00 : f32
    %26 = vector.broadcast %cst_19 : f32 to vector<16x256xf32>
    %27 = arith.maximumf %25, %26 : vector<16x256xf32>
    %28 = arith.truncf %27 : vector<16x256xf32> to vector<16x256xbf16>
    %c0_20 = arith.constant 0 : index
    %c0_21 = arith.constant 0 : index
    %29 = vector.load %arg2[%c0_20, %c0_21] : memref<8x16xbf16, #tpu.memory_space<vmem>>, vector<8x16xbf16>
    %cst_22 = arith.constant dense<0.000000e+00> : vector<8x256xf32>
    %30 = tpu.matmul %29, %28, %cst_22 {dimension_numbers = #tpu.dot_dimension_numbers<[1], [0], [0], [1], [0, 0, 1, 1], [], []>} : vector<8x16xbf16>, vector<16x256xbf16>, vector<8x256xf32> -> vector<8x256xf32>
    %31 = arith.truncf %30 : vector<8x256xf32> to vector<8x256xbf16>
    %c0_23 = arith.constant 0 : index
    %c0_24 = arith.constant 0 : index
    %32 = vector.load %arg5[%c0_23, %c0_24] : memref<256x128xbf16, #tpu.memory_space<vmem>>, vector<256x128xbf16>
    %cst_25 = arith.constant dense<0.000000e+00> : vector<8x128xf32>
    %33 = tpu.matmul %31, %32, %cst_25 {dimension_numbers = #tpu.dot_dimension_numbers<[1], [0], [0], [1], [0, 0, 1, 1], [], []>} : vector<8x256xbf16>, vector<256x128xbf16>, vector<8x128xf32> -> vector<8x128xf32>
    %c0_26 = arith.constant 0 : index
    %c0_27 = arith.constant 0 : index
    %34 = vector.load %arg9[%c0_26, %c0_27] : memref<1x128xf32, #tpu.memory_space<vmem>>, vector<1x128xf32>
    %35 = vector.broadcast %34 : vector<1x128xf32> to vector<8x128xf32>
    %36 = arith.addf %33, %35 : vector<8x128xf32>
    %c0_28 = arith.constant 0 : index
    %c0_29 = arith.constant 0 : index
    %37 = vector.load %arg10[%c0_28, %c0_29] : memref<8x128xf32, #tpu.memory_space<vmem>>, vector<8x128xf32>
    tpu.vector_store %arg10[%c0_28, %c0_29], %36 {strides = array<i32>} : memref<8x128xf32, #tpu.memory_space<vmem>>, vector<8x128xf32>,
    return
  }
}

</mosaic_0001>

<bundles_post_ra>
// kernel: graph_encoder.1
= control target key start
LH: loop header
LB: loop body
LE: loop exit
PB: predicated region body
PF: predicated region fallthrough
CT: control target
= control target key end

     0   :  { %v1033_v0 = vmov 0.0   ;;  %vm1034_vm0 = vmmov 0   ;;  %vm58_vm1 = vcmask 130048   ;;  %v1035_v29 = vmov 0   ;;  %s1328_s1 = inlined_call_operand.vmem [shape: bf16[16,128], index: 1, kind: input, shape index: {}]   ;;  %s1329_s0 = inlined_call_operand.vmem [shape: bf16[16,16], index: 0, kind: input, shape index: {}]   ;;  %s1330_s3 = inlined_call_operand.vmem [shape: bf16[128,256], index: 3, kind: input, shape index: {}]   ;;  %s1331_s6 = inlined_call_operand.vmem [shape: f32[1,128], index: 6, kind: input, shape index: {}]   ;;  %s1332_s4 = inlined_call_operand.vmem [shape: bf16[256,256], index: 4, kind: input, shape index: {}]   ;;  %s1333_s7 = inlined_call_operand.vmem [shape: f32[1,256], index: 7, kind: input, shape index: {}]   ;;  %s1334_s5 = inlined_call_operand.vmem [shape: bf16[256,128], index: 5, kind: input, shape index: {}]   ;;  %s1335_s8 = inlined_call_operand.vmem [shape: f32[1,256], index: 8, kind: input, shape index: {}]   ;;  %s1336_s2 = inlined_call_operand.vmem [shape: bf16[8,16], index: 2, kind: input, shape index: {}]   ;;  %s1337_s9 = inlined_call_operand.vmem [shape: f32[1,128], index: 9, kind: input, shape index: {}]   ;;  %s1338_s10 = inlined_call_operand.vmem [shape: f32[8,128], index: 10, kind: output, shape index: {}]  }
   0x1   :  { %928 = vmatprep.subr.bf16.mxu0 %v1033_v0  ;;  %v943_v1 = vld [vmem:[%s1328_s1] sm:$0xff]   ;;  %930 = vmatprep.mubr.msk.bf16.mxu0 %vm1034_vm0, %v1033_v0  ;;  %v950_v5 = vld [vmem:[%s1330_s3 + $0x14] ss:$8 sps:$4 sm:$0xff]   ;;  %v948_v6 = vld [vmem:[%s1330_s3 + $0x10] ss:$8 sps:$4 sm:$0xff]   ;;  %v166_v35 = vlaneseq }
   0x2   :  { %v1097_v2 = vld [vmem:[%s1329_s0] sm:$0xff]   ;;  %934 = vmatprep.subr.bf16.mxu1 %v1033_v0  ;;  %936 = vmatprep.mubr.msk.bf16.mxu1 %vm1034_vm0, %v1033_v0  ;;  %v956_v9 = vld [vmem:[%s1330_s3 + $0x34] ss:$8 sps:$4 sm:$0xff]   ;;  %v954_v10 = vld [vmem:[%s1330_s3 + $0x30] ss:$8 sps:$4 sm:$0xff]  }
   0x3   :  { %929 = vmatpush3.bf16.msra.mxu0 %v943_v1  ;;  %v945_v3 = vld [vmem:[%s1330_s3] ss:$8 sps:$4 sm:$0xff]   ;;  %v947_v4 = vld [vmem:[%s1330_s3 + $0x4] ss:$8 sps:$4 sm:$0xff]   ;;  %v962_v13 = vld [vmem:[%s1330_s3 + $0x54] ss:$8 sps:$4 sm:$0xff]  }
   0x4   :  { %256 = vmatprep.subr.bf16.mxu0 %v947_v4  ;;  %v953_v7 = vld [vmem:[%s1330_s3 + $0x24] ss:$8 sps:$4 sm:$0xff]   ;;  %v951_v8 = vld [vmem:[%s1330_s3 + $0x20] ss:$8 sps:$4 sm:$0xff]   ;;  %v960_v14 = vld [vmem:[%s1330_s3 + $0x50] ss:$8 sps:$4 sm:$0xff]  }
   0x5   :  { %v959_v11 = vld [vmem:[%s1330_s3 + $0x44] ss:$8 sps:$4 sm:$0xff]   ;;  %v957_v12 = vld [vmem:[%s1330_s3 + $0x40] ss:$8 sps:$4 sm:$0xff]   ;;  %v968_v27 = vld [vmem:[%s1330_s3 + $0x74] ss:$8 sps:$4 sm:$0xff]  }
   0x6   :  { %931 = vmatmul.mubr.msk.bf16.vlgmr.msra.gmra.mrb[0].mxu0 %vm58_vm1, %v1097_v2  ;;  %v965_v15 = vld [vmem:[%s1330_s3 + $0x64] ss:$8 sps:$4 sm:$0xff]   ;;  %v963_v16 = vld [vmem:[%s1330_s3 + $0x60] ss:$8 sps:$4 sm:$0xff]   ;;  %v966_v28 = vld [vmem:[%s1330_s3 + $0x70] ss:$8 sps:$4 sm:$0xff]  }
   0x7   :  { %257 = vmatpush1.bf16.msra.mxu0 %v945_v3  ;;  %v830_v17 = vld [vmem:[%s1331_s6] ss:$0 sm:$0xff]  ;;  %288 = vmatprep.mubr.bf16.mxu0 %v1035_v29  ;;  %v1154_v36 = vshrl.u32 %v166_v35, 7  ;;  %v971_v56 = vld [vmem:[%s1332_s4 + $0x4] ss:$8 sps:$4 sm:$0xff]  }
   0x8   :  { %258 = vmatprep.subr.bf16.mxu0 %v950_v5  ;;  %v164_v38 = vld [vmem:[%s1333_s7] sm:$0x3]  ;;  %v974_v58 = vld [vmem:[%s1332_s4 + $0x14] ss:$8 sps:$4 sm:$0xff]   ;;  %v972_v59 = vld [vmem:[%s1332_s4 + $0x10] ss:$8 sps:$4 sm:$0xff]  }
   0x9   :  { %v168_v37 = vsub.s32 0, %v1154_v36  ;;  %v172_v39 = vsub.s32 1, %v1154_v36  ;;  %v969_v57 = vld [vmem:[%s1332_s4] ss:$8 sps:$4 sm:$0xff]   ;;  %v977_v60 = vld [vmem:[%s1332_s4 + $0x24] ss:$8 sps:$4 sm:$0xff]  }
   0xa   :  { %v975_v61 = vld [vmem:[%s1332_s4 + $0x20] ss:$8 sps:$4 sm:$0xff]   ;;  %v980_v62 = vld [vmem:[%s1332_s4 + $0x34] ss:$8 sps:$4 sm:$0xff]   ;;  %v978_v63 = vld [vmem:[%s1332_s4 + $0x30] ss:$8 sps:$4 sm:$0xff]  }
   0xb   :  { %259 = vmatpush1.bf16.msra.mxu0 %v948_v6  ;;  %v169_v40 = vrot.slane %v164_v38, %v168_v37  ;;  %v173_v41 = vrot.slane %v164_v38, %v172_v39  ;;  %v983_v0 = vld [vmem:[%s1332_s4 + $0x44] ss:$8 sps:$4 sm:$0xff]   ;;  %v981_v1 = vld [vmem:[%s1332_s4 + $0x40] ss:$8 sps:$4 sm:$0xff]   ;;  %v984_v3 = vld [vmem:[%s1332_s4 + $0x50] ss:$8 sps:$4 sm:$0xff]  }
   0xc   :  { %260 = vmatprep.subr.bf16.mxu0 %v953_v7  ;;  %v989_v4 = vld [vmem:[%s1332_s4 + $0x64] ss:$8 sps:$4 sm:$0xff]   ;;  %v987_v5 = vld [vmem:[%s1332_s4 + $0x60] ss:$8 sps:$4 sm:$0xff]   ;;  %v992_v6 = vld [vmem:[%s1332_s4 + $0x74] ss:$8 sps:$4 sm:$0xff]  }
   0xd   :  { %v990_v7 = vld [vmem:[%s1332_s4 + $0x70] ss:$8 sps:$4 sm:$0xff]   ;;  %v603_v36 = vld [vmem:[%s1336_s2] sm:$0xf] }
   0xf   :  { %261 = vmatpush1.bf16.msra.mxu0 %v951_v8  ;;  %v995_v8 = vld [vmem:[%s1332_s4 + $0x84] ss:$8 sps:$4 sm:$0xff]  }
  0x10   :  { %262 = vmatprep.subr.bf16.mxu0 %v956_v9  ;;  %v993_v9 = vld [vmem:[%s1332_s4 + $0x80] ss:$8 sps:$4 sm:$0xff]  }
  0x13   :  { %263 = vmatpush1.bf16.msra.mxu0 %v954_v10  ;;  %v998_v10 = vld [vmem:[%s1332_s4 + $0x94] ss:$8 sps:$4 sm:$0xff]  }
  0x14   :  { %264 = vmatprep.subr.bf16.mxu0 %v959_v11  ;;  %v996_v11 = vld [vmem:[%s1332_s4 + $0x90] ss:$8 sps:$4 sm:$0xff]  }
  0x17   :  { %265 = vmatpush1.bf16.msra.mxu0 %v957_v12  ;;  %v1001_v12 = vld [vmem:[%s1332_s4 + $0xa4] ss:$8 sps:$4 sm:$0xff]  }
  0x18   :  { %266 = vmatprep.subr.bf16.mxu0 %v962_v13  ;;  %v999_v13 = vld [vmem:[%s1332_s4 + $0xa0] ss:$8 sps:$4 sm:$0xff]  }
  0x1b   :  { %267 = vmatpush1.bf16.msra.mxu0 %v960_v14  ;;  %v1004_v14 = vld [vmem:[%s1332_s4 + $0xb4] ss:$8 sps:$4 sm:$0xff]  }
  0x1c   :  { %268 = vmatprep.subr.bf16.mxu0 %v965_v15  ;;  %v1002_v15 = vld [vmem:[%s1332_s4 + $0xb0] ss:$8 sps:$4 sm:$0xff]  }
  0x1f   :  { %269 = vmatpush1.bf16.msra.mxu0 %v963_v16  ;;  %v1007_v16 = vld [vmem:[%s1332_s4 + $0xc4] ss:$8 sps:$4 sm:$0xff]  }
  0x20   :  { %270 = vmatprep.subr.bf16.mxu0 %v968_v27 }
  0x23   :  { %271 = vmatpush1.bf16.msra.mxu0 %v966_v28 }
  0xd9   :  { %v96_v18 = vpop.f32.mrb[0].mxu0 }
  0xda   :  { %v97_v19 = vadd.f32 %v830_v17, %v96_v18  ;;  %v932_v20 = vpop.f32.mrb[1].mxu0  ;;  %v1010_v18 = vld [vmem:[%s1332_s4 + $0xd4] ss:$8 sps:$4 sm:$0xff]  }
  0xdb   :  { %v99_v21 = vpop.f32.mrb[2].mxu0  ;;  %v1013_v20 = vld [vmem:[%s1332_s4 + $0xe4] ss:$8 sps:$4 sm:$0xff]  }
  0xdc   :  { %v100_v22 = vadd.f32 %v830_v17, %v99_v21  ;;  %v933_v23 = vpop.f32.mrb[3].mxu0  ;;  %v103_v24 = vmax.f32 %v97_v19, 0.0  ;;  %v1005_v17 = vld [vmem:[%s1332_s4 + $0xc0] ss:$8 sps:$4 sm:$0xff]   ;;  %v1008_v19 = vld [vmem:[%s1332_s4 + $0xd0] ss:$8 sps:$4 sm:$0xff]  }
  0xdd   :  { %v1011_v21 = vld [vmem:[%s1332_s4 + $0xe0] ss:$8 sps:$4 sm:$0xff]   ;;  %v1014_v23 = vld [vmem:[%s1332_s4 + $0xf0] ss:$8 sps:$4 sm:$0xff]  }
  0xde   :  { %v104_v25 = vmax.f32 %v100_v22, 0.0  ;;  %v1016_v22 = vld [vmem:[%s1332_s4 + $0xf4] ss:$8 sps:$4 sm:$0xff]  }
  0xe0   :  { %v105_v26 = vpack.c.bf16 %v104_v25, %v103_v24 }
  0xe2   :  { %935 = vmatpush3.bf16.msra.mxu1 %v105_v26 }
  0xe5   :  { %937 = vmatmul.mubr.msk.bf16.vlgmr.msra.gmra.mrb[0].mxu1 %vm58_vm1, %v1097_v2 }
  0xe6   :  { %337 = vmatprep.mubr.bf16.mxu1 %v1035_v29 }
 0x1b8   :  { %v140_v30 = vpop.f32.mrb[0].mxu1 }
 0x1b9   :  { %v938_v31 = vpop.f32.mrb[1].mxu1 }
 0x1ba   :  { %v143_v32 = vpop.f32.mrb[2].mxu1 }
 0x1bb   :  { %v147_v33 = vpack.c.bf16 %v143_v32, %v140_v30  ;;  %v939_v34 = vpop.f32.mrb[3].mxu1  ;;  %v382_v30 = vld [vmem:[%s1335_s8] sm:$0x3] }
 0x1bc   :  { %v387_v31 = vrot.slane %v382_v30, %v168_v37  ;;  %v391_v32 = vrot.slane %v382_v30, %v172_v39  ;;  %v1017_v37 = vld [vmem:[%s1334_s5 + $0x40] sm:$0xff]  }
 0x1bd   :  { %289 = vmatmul.mubr.bf16.vlgmr.msra.gmra.mrb[4].mxu0 %v147_v33  ;;  %v1018_v39 = vld [vmem:[%s1334_s5] sm:$0xff]  }
 0x1be   :  { %639 = vmatprep.mubr.bf16.mxu0 %v1035_v29 }
 0x290   :  { %v290_v42 = vpop.f32.mrb[4].mxu0 }
 0x291   :  { %v291_v43 = vadd.f32 %v290_v42, %v169_v40  ;;  %v292_v44 = vpop.f32.mrb[5].mxu0 }
 0x292   :  { %v293_v45 = vadd.f32 %v292_v44, %v173_v41  ;;  %v294_v46 = vpop.f32.mrb[6].mxu0 }
 0x293   :  { %v295_v47 = vadd.f32 %v294_v46, %v169_v40  ;;  %v296_v48 = vpop.f32.mrb[7].mxu0  ;;  %v299_v50 = vmax.f32 %v291_v43, 0.0 }
 0x294   :  { %v297_v49 = vadd.f32 %v296_v48, %v173_v41  ;;  %v300_v52 = vmax.f32 %v293_v45, 0.0 }
 0x295   :  { %v301_v51 = vmax.f32 %v295_v47, 0.0 }
 0x296   :  { %v302_v53 = vmax.f32 %v297_v49, 0.0 }
 0x297   :  { %v303_v54 = vpack.c.bf16 %v301_v51, %v299_v50  ;;  %v1019_v50 = vld [vmem:[%s1334_s5 + $0x48] sm:$0xff]  }
 0x298   :  { %v304_v55 = vpack.c.bf16 %v302_v53, %v300_v52  ;;  %v1020_v51 = vld [vmem:[%s1334_s5 + $0x8] sm:$0xff]   ;;  %v1021_v52 = vld [vmem:[%s1334_s5 + $0x50] sm:$0xff]  }
 0x299   :  { %v1022_v53 = vld [vmem:[%s1334_s5 + $0x10] sm:$0xff]  }
 0x29a   :  { %305 = vmatprep.subr.bf16.mxu1 %v304_v55  ;;  %v1024_v55 = vld [vmem:[%s1334_s5 + $0x18] sm:$0xff]  }
 0x29b   :  { %306 = vmatpush1.bf16.msra.mxu1 %v303_v54  ;;  %v1023_v54 = vld [vmem:[%s1334_s5 + $0x58] sm:$0xff]  }
 0x29c   :  { %554 = vmatprep.subr.bf16.mxu1 %v971_v56  ;;  %v1025_v56 = vld [vmem:[%s1334_s5 + $0x60] sm:$0xff]  }
 0x29e   :  { %851 = vmatmul.mubr.msk.bf16.vlgmr.msra.gmra.mrb[4].mxu1 %vm58_vm1, %v1097_v2  ;;  %v986_v2 = vld [vmem:[%s1332_s4 + $0x54] ss:$8 sps:$4 sm:$0xff]  }
 0x29f   :  { %555 = vmatpush1.bf16.msra.mxu1 %v969_v57  ;;  %v1026_v57 = vld [vmem:[%s1334_s5 + $0x20] sm:$0xff]  }
 0x2a0   :  { %556 = vmatprep.subr.bf16.mxu1 %v974_v58  ;;  %v1027_v58 = vld [vmem:[%s1334_s5 + $0x68] sm:$0xff]  }
 0x2a3   :  { %557 = vmatpush1.bf16.msra.mxu1 %v972_v59  ;;  %v1028_v59 = vld [vmem:[%s1334_s5 + $0x28] sm:$0xff]  }
 0x2a4   :  { %558 = vmatprep.subr.bf16.mxu1 %v977_v60  ;;  %v1029_v60 = vld [vmem:[%s1334_s5 + $0x70] sm:$0xff]  }
 0x2a7   :  { %559 = vmatpush1.bf16.msra.mxu1 %v975_v61  ;;  %v1030_v61 = vld [vmem:[%s1334_s5 + $0x30] sm:$0xff]  }
 0x2a8   :  { %560 = vmatprep.subr.bf16.mxu1 %v980_v62  ;;  %v1031_v62 = vld [vmem:[%s1334_s5 + $0x78] sm:$0xff]  }
 0x2ab   :  { %561 = vmatpush1.bf16.msra.mxu1 %v978_v63  ;;  %v1032_v63 = vld [vmem:[%s1334_s5 + $0x38] sm:$0xff]  }
 0x2ac   :  { %562 = vmatprep.subr.bf16.mxu1 %v983_v0 }
 0x2af   :  { %563 = vmatpush1.bf16.msra.mxu1 %v981_v1 }
 0x2b0   :  { %564 = vmatprep.subr.bf16.mxu1 %v986_v2 }
 0x2b3   :  { %565 = vmatpush1.bf16.msra.mxu1 %v984_v3 }
 0x2b4   :  { %566 = vmatprep.subr.bf16.mxu1 %v989_v4 }
 0x2b7   :  { %567 = vmatpush1.bf16.msra.mxu1 %v987_v5 }
 0x2b8   :  { %568 = vmatprep.subr.bf16.mxu1 %v992_v6 }
 0x2bb   :  { %569 = vmatpush1.bf16.msra.mxu1 %v990_v7  ;;  %v885_v7 = vld [vmem:[%s1337_s9] ss:$0 sm:$0xff] }
 0x2bc   :  { %570 = vmatprep.subr.bf16.mxu1 %v995_v8 }
 0x2bf   :  { %571 = vmatpush1.bf16.msra.mxu1 %v993_v9 }
 0x2c0   :  { %572 = vmatprep.subr.bf16.mxu1 %v998_v10 }
 0x2c3   :  { %573 = vmatpush1.bf16.msra.mxu1 %v996_v11 }
 0x2c4   :  { %574 = vmatprep.subr.bf16.mxu1 %v1001_v12 }
 0x2c7   :  { %575 = vmatpush1.bf16.msra.mxu1 %v999_v13 }
 0x2c8   :  { %576 = vmatprep.subr.bf16.mxu1 %v1004_v14 }
 0x2cb   :  { %577 = vmatpush1.bf16.msra.mxu1 %v1002_v15 }
 0x2cc   :  { %578 = vmatprep.subr.bf16.mxu1 %v1007_v16 }
 0x2cf   :  { %579 = vmatpush1.bf16.msra.mxu1 %v1005_v17 }
 0x2d0   :  { %580 = vmatprep.subr.bf16.mxu1 %v1010_v18 }
 0x2d3   :  { %581 = vmatpush1.bf16.msra.mxu1 %v1008_v19 }
 0x2d4   :  { %582 = vmatprep.subr.bf16.mxu1 %v1013_v20 }
 0x2d7   :  { %583 = vmatpush1.bf16.msra.mxu1 %v1011_v21 }
 0x2d8   :  { %584 = vmatprep.subr.bf16.mxu1 %v1016_v22 }
 0x2db   :  { %585 = vmatpush1.bf16.msra.mxu1 %v1014_v23 }
 0x371   :  { %v339_v24 = vpop.f32.mrb[4].mxu1 }
 0x372   :  { %v341_v25 = vpop.f32.mrb[5].mxu1 }
 0x373   :  { %v343_v26 = vpop.f32.mrb[6].mxu1 }
 0x374   :  { %v348_v27 = vpack.c.bf16 %v343_v26, %v339_v24  ;;  %v345_v28 = vpop.f32.mrb[7].mxu1 }
 0x375   :  { %v349_v29 = vpack.c.bf16 %v345_v28, %v341_v25 }
 0x377   :  { %586 = vmatprep.mubr.bf16.mxu1 %v349_v29 }
 0x378   :  { %587 = vmatmul.mubr.bf16.vlgmr.msra.gmra.mrb[8].mxu1 %v348_v27 }
 0x44b   :  { %v588_v33 = vpop.f32.mrb[8].mxu1 }
 0x44c   :  { %v589_v34 = vadd.f32 %v588_v33, %v387_v31  ;;  %v590_v35 = vpop.f32.mrb[9].mxu1 }
 0x44d   :  { %v591_v38 = vadd.f32 %v590_v35, %v391_v32  ;;  %v592_v40 = vpop.f32.mrb[10].mxu1 }
 0x44e   :  { %v593_v41 = vadd.f32 %v592_v40, %v387_v31  ;;  %v594_v42 = vpop.f32.mrb[11].mxu1  ;;  %v597_v44 = vmax.f32 %v589_v34, 0.0 }
 0x44f   :  { %v595_v43 = vadd.f32 %v594_v42, %v391_v32  ;;  %v598_v46 = vmax.f32 %v591_v38, 0.0 }
 0x450   :  { %v599_v45 = vmax.f32 %v593_v41, 0.0 }
 0x451   :  { %v600_v47 = vmax.f32 %v595_v43, 0.0 }
 0x452   :  { %v601_v48 = vpack.c.bf16 %v599_v45, %v597_v44 }
 0x453   :  { %v602_v49 = vpack.c.bf16 %v600_v47, %v598_v46 }
 0x455   :  { %607 = vmatprep.subr.bf16.mxu0 %v602_v49 }
 0x456   :  { %608 = vmatpush1.bf16.msra.mxu0 %v601_v48 }
 0x457   :  { %906 = vmatprep.subr.bf16.mxu0 %v1017_v37 }
 0x459   :  { %884 = vmatmul.mubr.msk.bf16.vlgmr.msra.gmra.mrb[8].mxu0 %vm58_vm1, %v603_v36 }
 0x45a   :  { %907 = vmatpush3.bf16.msra.mxu0 %v1018_v39 }
 0x45b   :  { %908 = vmatprep.subr.bf16.mxu0 %v1019_v50 }
 0x45e   :  { %909 = vmatpush3.bf16.msra.mxu0 %v1020_v51 }
 0x45f   :  { %910 = vmatprep.subr.bf16.mxu0 %v1021_v52 }
 0x462   :  { %911 = vmatpush3.bf16.msra.mxu0 %v1022_v53 }
 0x463   :  { %912 = vmatprep.subr.bf16.mxu0 %v1023_v54 }
 0x466   :  { %913 = vmatpush3.bf16.msra.mxu0 %v1024_v55 }
 0x467   :  { %914 = vmatprep.subr.bf16.mxu0 %v1025_v56 }
 0x46a   :  { %915 = vmatpush3.bf16.msra.mxu0 %v1026_v57 }
 0x46b   :  { %916 = vmatprep.subr.bf16.mxu0 %v1027_v58 }
 0x46e   :  { %917 = vmatpush3.bf16.msra.mxu0 %v1028_v59 }
 0x46f   :  { %918 = vmatprep.subr.bf16.mxu0 %v1029_v60 }
 0x472   :  { %919 = vmatpush3.bf16.msra.mxu0 %v1030_v61 }
 0x473   :  { %920 = vmatprep.subr.bf16.mxu0 %v1031_v62 }
 0x476   :  { %921 = vmatpush3.bf16.msra.mxu0 %v1032_v63 }
 0x52c   :  { %v641_v0 = vpop.f32.mrb[8].mxu0 }
 0x52d   :  { %v643_v1 = vpop.f32.mrb[9].mxu0  ;;  %v648_v4 = vpack.c.bf16 %v641_v0, %v641_v0 }
 0x52e   :  { %v649_v2 = vpack.c.bf16 %v643_v1, %v643_v1  ;;  %v645_v3 = vpop.f32.mrb[10].mxu0 }
 0x52f   :  { %v646_v5 = vpop.f32.mrb[11].mxu0 }
 0x530   :  { %817 = vmatprep.mubr.bf16.mxu0 %v649_v2 }
 0x531   :  { %818 = vmatmul.mubr.bf16.vlgmr.msra.gmra.mrb[12].mxu0 %v648_v4 }
 0x604   :  { %v922_v6 = vpop.f32.mrb[12].mxu0 }
 0x605   :  { %v923_v8 = vpop.f32.mrb[13].mxu0 }
 0x606   :  { %v924_v9 = vadd.f32 %v923_v8, %v922_v6  ;;  %v925_v10 = vpop.f32.mrb[14].mxu0 }
 0x607   :  { %v926_v11 = vpop.f32.mrb[15].mxu0 }
 0x608   :  { %v820_v12 = vadd.f32 %v924_v9, %v885_v7 }
 0x60a   :  { %825 = vst [vmem:[%s1338_s10] sm:$0xff] %v820_v12 }

</bundles_post_ra>
